<compile_context>
chip_gen: v7x
topology: tpu7x:2x2x1
jax: 0.10.0
libtpu: 0.0.40
codegen_flags: <defaults>
</compile_context>

<pallas_src>
import jax
import jax.numpy as jnp
from jax.experimental import pallas as pl
from jax.experimental.pallas import tpu as pltpu


def _round_up(x, m):
    return ((x + m - 1) // m) * m


def _pick_batch_tile(Bp, block_b):
    """Pick the batch tile TB and (possibly padded) batch extent.

    Prefers the largest multiple-of-8 divisor of Bp that is <= block_b so the
    wrapper never has to materialize a padded copy of x.  When Bp >= 16 the
    tile is capped at Bp//2 so the grid has at least two steps (lets v7x's two
    TensorCores share the "parallel" axis; harmless on v5e/v6e).  If Bp has no
    reasonable divisor (pathological ragged batch), fall back to a full-size
    tile plus a remainder pad rather than thousands of tiny grid steps.
    """
    limit = min(_round_up(block_b, 8), Bp)
    if Bp >= 16:
        limit = min(limit, Bp // 2)
    limit = max(8, (limit // 8) * 8)
    best = 8
    for tb in range(limit, 7, -8):
        if Bp % tb == 0:
            best = tb
            break
    if best * 4 >= limit:
        return best, Bp
    # Fallback: accept one padded remainder tile instead of tiny tiles.
    return limit, _round_up(Bp, limit)


def _vmem_limit_bytes(TB, F, Hp, Tp, T, itemsize=4):
    # Double-buffered operands + f32 intermediates (h and the pre-slice out),
    # plus headroom for compiler scratch.  Clamp to [32 MiB, 56 MiB] so it is
    # above v5e's 16 MiB default and below v7x's 64 MiB physical VMEM.
    operands = 2 * (TB * F + TB * T + F * Hp + Hp + Hp * Tp + T)
    intermediates = TB * Hp + TB * Tp
    est = itemsize * (operands + intermediates) + (8 << 20)
    return int(min(max(est, 32 << 20), 56 << 20))


def mlp_kernel(x_ref, w1_ref, b1_ref, w2_ref, b2_ref, o_ref):
    # Hidden layer: x @ w1 + b1, then ReLU (MXU matmul, f32 accumulate).
    h = jnp.dot(x_ref[...], w1_ref[...], preferred_element_type=jnp.float32)
    h = jnp.maximum(h + b1_ref[...], 0.0)          # b1 is (1, Hp), broadcast over batch
    # Output layer on the 128-padded w2 (full-width MXU pass)...
    out = jnp.dot(h, w2_ref[...], preferred_element_type=jnp.float32)
    # ...but only the T valid lanes are biased and written back to HBM.
    T = o_ref.shape[-1]
    o_ref[...] = (out[:, :T] + b2_ref[...]).astype(o_ref.dtype)


def mlp_forward(x, w1, b1, w2, b2, *, block_b=4096):
    """y = relu(x @ w1 + b1) @ w2 + b2, tiled over the batch axis."""
    B, F = x.shape
    H = w1.shape[1]
    T = w2.shape[1]

    # Pad hidden / second-matmul output dims to the 128-lane boundary
    # (zeros => identical result); the HBM output stays unpadded at T lanes.
    Hp = _round_up(H, 128)
    Tp = _round_up(T, 128)

    # Sublane alignment only (<= 7 extra rows), then choose the batch tile.
    B8 = _round_up(B, 8)
    TB, Bp = _pick_batch_tile(B8, block_b)

    xp = x if Bp == B else jnp.pad(x, ((0, Bp - B), (0, 0)))
    w1p = jnp.pad(w1, ((0, 0), (0, Hp - H)))
    b1p = jnp.pad(jnp.reshape(b1, (1, H)), ((0, 0), (0, Hp - H)))
    w2p = jnp.pad(w2, ((0, Hp - H), (0, Tp - T)))
    b2r = jnp.reshape(b2, (1, T))

    out = pl.pallas_call(
        mlp_kernel,
        out_shape=jax.ShapeDtypeStruct((Bp, T), x.dtype),
        grid=(Bp // TB,),
        in_specs=[
            pl.BlockSpec((TB, F), lambda i: (i, 0)),    # streamed batch tiles
            pl.BlockSpec((F, Hp), lambda i: (0, 0)),    # resident weights
            pl.BlockSpec((1, Hp), lambda i: (0, 0)),
            pl.BlockSpec((Hp, Tp), lambda i: (0, 0)),
            pl.BlockSpec((1, T), lambda i: (0, 0)),
        ],
        out_specs=pl.BlockSpec((TB, T), lambda i: (i, 0)),   # unpadded writeback
        compiler_params=pltpu.CompilerParams(
            dimension_semantics=("parallel",),
            vmem_limit_bytes=_vmem_limit_bytes(TB, F, Hp, Tp, T)),
    )(xp, w1p, b1p, w2p, b2r)

    return out if Bp == B else out[:B]


def init_params(key, num_features, num_targets, hidden=120):
    # Mimic nn.Linear default init: U(-1/sqrt(fan_in), 1/sqrt(fan_in)).
    k1, k2, k3, k4 = jax.random.split(key, 4)
    bound1 = 1.0 / jnp.sqrt(num_features)
    bound2 = 1.0 / jnp.sqrt(hidden)
    w1 = jax.random.uniform(k1, (num_features, hidden), jnp.float32, -bound1, bound1)
    b1 = jax.random.uniform(k2, (1, hidden), jnp.float32, -bound1, bound1)
    w2 = jax.random.uniform(k3, (hidden, num_targets), jnp.float32, -bound2, bound2)
    b2 = jax.random.uniform(k4, (1, num_targets), jnp.float32, -bound2, bound2)
    return w1, b1, w2, b2


if __name__ == "__main__":
    key = jax.random.PRNGKey(0)
    kx, kp, kx2 = jax.random.split(key, 3)

    batch = 8
    num_features = 32
    num_targets = 8

    x = jax.random.normal(kx, (batch, num_features), jnp.float32)
    w1, b1, w2, b2 = init_params(kp, num_features, num_targets)

    # Small-shape check (single grid step).
    y = jax.block_until_ready(mlp_forward(x, w1, b1, w2, b2))
    ref = jnp.maximum(x @ w1 + b1, 0.0) @ w2 + b2
    assert y.shape == (batch, num_targets)
    assert jnp.allclose(y, ref, atol=1e-5, rtol=1e-5)

    # Multi-tile check (exercises the batch grid + resident weights).
    x2 = jax.random.normal(kx2, (64, num_features), jnp.float32)
    y2 = jax.block_until_ready(mlp_forward(x2, w1, b1, w2, b2, block_b=32))
    ref2 = jnp.maximum(x2 @ w1 + b1, 0.0) @ w2 + b2
    assert y2.shape == (64, num_targets)
    assert jnp.allclose(y2, ref2, atol=1e-5, rtol=1e-5)

    print("KERNEL_OK")
</pallas_src>

<mosaic_0001>
module attributes {stable_mosaic.version = 11 : i64} {
  func.func @mlp_kernel(%arg0: i32, %arg1: memref<8x32xf32, #tpu.memory_space<vmem>>, %arg2: memref<32x128xf32, #tpu.memory_space<vmem>>, %arg3: memref<1x128xf32, #tpu.memory_space<vmem>>, %arg4: memref<128x128xf32, #tpu.memory_space<vmem>>, %arg5: memref<1x8xf32, #tpu.memory_space<vmem>>, %arg6: memref<8x8xf32, #tpu.memory_space<vmem>>) attributes {dimension_semantics = [#tpu.dimension_semantics<parallel>], iteration_bounds = array<i64: 1>, scalar_prefetch = 0 : i64, scratch_operands = 0 : i64, tpu.core_type = #tpu.core_type<tc>, window_params = [{transform_indices = @transform_0, window_bounds = array<i64: 8, 32>}, {pipeline_mode = #tpu.pipeline_mode<synchronous>, transform_indices = @transform_1, window_bounds = array<i64: 32, 128>}, {pipeline_mode = #tpu.pipeline_mode<synchronous>, transform_indices = @transform_2, window_bounds = array<i64: 1, 128>}, {pipeline_mode = #tpu.pipeline_mode<synchronous>, transform_indices = @transform_3, window_bounds = array<i64: 128, 128>}, {pipeline_mode = #tpu.pipeline_mode<synchronous>, transform_indices = @transform_4, window_bounds = array<i64: 1, 8>}, {transform_indices = @transform_5, window_bounds = array<i64: 8, 8>}]} {
    %c0 = arith.constant 0 : index
    %c0_0 = arith.constant 0 : index
    %0 = vector.load %arg1[%c0, %c0_0] : memref<8x32xf32, #tpu.memory_space<vmem>>, vector<8x32xf32>
    %c0_1 = arith.constant 0 : index
    %c0_2 = arith.constant 0 : index
    %1 = vector.load %arg2[%c0_1, %c0_2] : memref<32x128xf32, #tpu.memory_space<vmem>>, vector<32x128xf32>
    %cst = arith.constant dense<0.000000e+00> : vector<8x128xf32>
    %2 = tpu.matmul %0, %1, %cst {dimension_numbers = #tpu.dot_dimension_numbers<[1], [0], [0], [1], [0, 0, 1, 1], [], []>} : vector<8x32xf32>, vector<32x128xf32>, vector<8x128xf32> -> vector<8x128xf32>
    %c0_3 = arith.constant 0 : index
    %c0_4 = arith.constant 0 : index
    %3 = vector.load %arg3[%c0_3, %c0_4] : memref<1x128xf32, #tpu.memory_space<vmem>>, vector<1x128xf32>
    %4 = vector.broadcast %3 : vector<1x128xf32> to vector<8x128xf32>
    %5 = arith.addf %2, %4 : vector<8x128xf32>
    %cst_5 = arith.constant 0.000000e+00 : f32
    %6 = vector.broadcast %cst_5 : f32 to vector<8x128xf32>
    %7 = arith.maximumf %5, %6 : vector<8x128xf32>
    %c0_6 = arith.constant 0 : index
    %c0_7 = arith.constant 0 : index
    %8 = vector.load %arg4[%c0_6, %c0_7] : memref<128x128xf32, #tpu.memory_space<vmem>>, vector<128x128xf32>
    %cst_8 = arith.constant dense<0.000000e+00> : vector<8x128xf32>
    %9 = tpu.matmul %7, %8, %cst_8 {dimension_numbers = #tpu.dot_dimension_numbers<[1], [0], [0], [1], [0, 0, 1, 1], [], []>} : vector<8x128xf32>, vector<128x128xf32>, vector<8x128xf32> -> vector<8x128xf32>
    %10 = vector.extract_strided_slice %9 {offsets = [0, 0], sizes = [8, 8], strides = [1, 1]} : vector<8x128xf32> to vector<8x8xf32>
    %c0_9 = arith.constant 0 : index
    %c0_10 = arith.constant 0 : index
    %11 = vector.load %arg5[%c0_9, %c0_10] : memref<1x8xf32, #tpu.memory_space<vmem>>, vector<1x8xf32>
    %12 = vector.broadcast %11 : vector<1x8xf32> to vector<8x8xf32>
    %13 = arith.addf %10, %12 : vector<8x8xf32>
    %c0_11 = arith.constant 0 : index
    %c0_12 = arith.constant 0 : index
    %14 = vector.load %arg6[%c0_11, %c0_12] : memref<8x8xf32, #tpu.memory_space<vmem>>, vector<8x8xf32>
    tpu.vector_store %arg6[%c0_11, %c0_12], %13 {strides = array<i32>} : memref<8x8xf32, #tpu.memory_space<vmem>>, vector<8x8xf32>,
    return
  }
  func.func @transform_0(%arg0: i32) -> (i32, i32) {
    %c0_i32 = arith.constant 0 : i32
    %c0_i32_0 = arith.constant 0 : i32
    return %arg0, %c0_i32 : i32, i32
  }
  func.func @transform_1(%arg0: i32) -> (i32, i32) {
    %c0_i32 = arith.constant 0 : i32
    %c0_i32_0 = arith.constant 0 : i32
    %c0_i32_1 = arith.constant 0 : i32
    return %c0_i32, %c0_i32_0 : i32, i32
  }
  func.func @transform_2(%arg0: i32) -> (i32, i32) {
    %c0_i32 = arith.constant 0 : i32
    %c0_i32_0 = arith.constant 0 : i32
    %c0_i32_1 = arith.constant 0 : i32
    return %c0_i32, %c0_i32_0 : i32, i32
  }
  func.func @transform_3(%arg0: i32) -> (i32, i32) {
    %c0_i32 = arith.constant 0 : i32
    %c0_i32_0 = arith.constant 0 : i32
    %c0_i32_1 = arith.constant 0 : i32
    return %c0_i32, %c0_i32_0 : i32, i32
  }
  func.func @transform_4(%arg0: i32) -> (i32, i32) {
    %c0_i32 = arith.constant 0 : i32
    %c0_i32_0 = arith.constant 0 : i32
    %c0_i32_1 = arith.constant 0 : i32
    return %c0_i32, %c0_i32_0 : i32, i32
  }
  func.func @transform_5(%arg0: i32) -> (i32, i32) {
    %c0_i32 = arith.constant 0 : i32
    %c0_i32_0 = arith.constant 0 : i32
    return %arg0, %c0_i32 : i32, i32
  }
}

</mosaic_0001>

<bundles_post_ra>
// kernel: tpu_custom_call.1
= control target key start
LH: loop header
LB: loop body
LE: loop exit
PB: predicated region body
PF: predicated region fallthrough
CT: control target
= control target key end

     0   :  { %10 = vsyncpa [#allocation3], 0  ;;  %s562_s0 = inlined_call_operand.hbm [shape: f32[8,32], index: 0, kind: input, shape index: {}]   ;;  %s563_s1 = inlined_call_operand.hbm [shape: f32[32,128], index: 1, kind: input, shape index: {}]   ;;  %s564_s2 = inlined_call_operand.vmem [shape: f32[1,128], index: 2, kind: input, shape index: {}]   ;;  %s565_s3 = inlined_call_operand.hbm [shape: f32[128,128], index: 3, kind: input, shape index: {}]   ;;  %s566_s4 = inlined_call_operand.vmem [shape: f32[1,8], index: 4, kind: input, shape index: {}]   ;;  %s567_s5 = inlined_call_operand.hbm [shape: f32[8,8], index: 5, kind: output, shape index: {}]  }
   0x1   :  { %11 = vsyncpa [#allocation6], 0 }
   0x2   :  { %12 = vsyncpa [#allocation4], 0  ;;  %s463_s18 = smov [#allocation5]   ;;  %s369_s22 = scalar_lea.hbm %s563_s1, 512 }
   0x3   :  { %s28_s19 = sshll.u32 %s463_s18, 4  ;;  %p370_p0 = scmp.ne.s32.totalorder %s563_s1, %s369_s22  ;;  %s29_s19 = int_to_ptr.vmem [resolvable:$true] %s28_s19 }
   0x4   :  { %p373_p1 = scmp.lt.u32.totalorder %s369_s22, %s563_s1 }
   0x6   :  { %p375_p2 = pnand %p373_p1, %p370_p0 }
   0x8   :  { %378 = shalt.err (!%p375_p2)
}
   0x9   :  { %s379_s27 = scalar_lea.vmem %s29_s19, 512  ;;  %p384_p4 = scmp.lt.s32.totalorder %s29_s19, %s29_s19 }
   0xa   :  { %p380_p3 = scmp.ne.s32.totalorder %s29_s19, %s379_s27  ;;  %p385_p5 = scmp.lt.s32.totalorder %s379_s27, %s379_s27 }
   0xc   :  { %p386_p6 = por %p385_p5, %p384_p4 }
   0xe   :  { %p387_p7 = pnand %p386_p6, %p380_p3 }
  0x10   :  { %390 = shalt.err (!%p387_p7)
}
  0x11   :  { %s464_s28 = smov 128   ;;  %s465_s29 = smov 8  }
  0x12   :  { %34 = dma.hbm_to_vmem [thread:$0]  %s563_s1, 512, %s29_s19, [#allocation6], %s464_s28, %s464_s28, %s465_s29  }
  0x13   :  { %s466_s7 = smov [#allocation2]   ;;  %s467_s9 = smov [#allocation7]  }
  0x14   :  { %s19_s8 = sshll.u32 %s466_s7, 4  ;;  %s42_s10 = sshll.u32 %s467_s9, 4  ;;  %s20_s8 = int_to_ptr.vmem [resolvable:$true] %s19_s8  ;;  %s43_s10 = int_to_ptr.vmem [resolvable:$true] %s42_s10 }
  0x15   :  { %s391_s13 = scalar_lea.hbm %s562_s0, 128 }
  0x16   :  { %p392_p8 = scmp.ne.s32.totalorder %s562_s0, %s391_s13  ;;  %p395_p9 = scmp.lt.u32.totalorder %s391_s13, %s562_s0 }
  0x18   :  { %p397_p10 = pnand %p395_p9, %p392_p8 }
  0x1a   :  { %400 = shalt.err (!%p397_p10)
}
  0x1b   :  { %s401_s1 = scalar_lea.vmem %s20_s8, 128  ;;  %p406_p12 = scmp.lt.s32.totalorder %s20_s8, %s20_s8 }
  0x1c   :  { %p402_p11 = scmp.ne.s32.totalorder %s20_s8, %s401_s1  ;;  %p407_p13 = scmp.lt.s32.totalorder %s401_s1, %s401_s1 }
  0x1e   :  { %p408_p0 = por %p407_p13, %p406_p12 }
  0x20   :  { %p409_p1 = pnand %p408_p0, %p402_p11 }
  0x22   :  { %412 = shalt.err (!%p409_p1)
}
  0x23   :  { %22 = dma.hbm_to_vmem [thread:$0]  %s562_s0, 128, %s20_s8, [#allocation3]  }
  0x24   :  { %s413_s22 = scalar_lea.hbm %s565_s3, 2048 }
  0x25   :  { %p414_p2 = scmp.ne.s32.totalorder %s565_s3, %s413_s22  ;;  %p417_p3 = scmp.lt.u32.totalorder %s413_s22, %s565_s3 }
  0x27   :  { %p419_p4 = pnand %p417_p3, %p414_p2 }
  0x29   :  { %422 = shalt.err (!%p419_p4)
}
  0x2a   :  { %s423_s27 = scalar_lea.vmem %s43_s10, 2048  ;;  %p428_p6 = scmp.lt.s32.totalorder %s43_s10, %s43_s10 }
  0x2b   :  { %p424_p5 = scmp.ne.s32.totalorder %s43_s10, %s423_s27  ;;  %p429_p7 = scmp.lt.s32.totalorder %s423_s27, %s423_s27 }
  0x2d   :  { %p430_p8 = por %p429_p7, %p428_p6 }
  0x2f   :  { %p431_p9 = pnand %p430_p8, %p424_p5 }
  0x31   :  { %434 = shalt.err (!%p431_p9)
}
  0x32   :  { %48 = dma.hbm_to_vmem [thread:$0]  %s565_s3, 2048, %s43_s10, [#allocation6], %s464_s28, %s464_s28, %s465_s29  }
  0x33   :  { %457 = dma.done.wait [#allocation3], 128  }
  0x34   :  { %458 = vsyncadd [#allocation3], 4294967168 }
  0x35   :  { %459 = dma.done.wait [#allocation6], 2560  }
  0x36   :  { %460 = vsyncadd [#allocation6], 4294964736  ;;  %v468_v0 = vmov 0.0|0.0   ;;  %vm469_vm0 = vmmov 0   ;;  %v470_v1 = vmov 0.0   ;;  %v61_v2 = vld [vmem:[#allocation5] sm:$0xff] }
  0x37   :  { %330 = vmatprep.subr.bf16.mxu0 %v468_v0  ;;  %292 = vmatprep.mubr.msk.f32.mxu0 %vm469_vm0, %v470_v1  ;;  %v62_v3 = vld [vmem:[#allocation5 + $0x8] sm:$0xff]  ;;  %v63_v4 = vld [vmem:[#allocation5 + $0x10] sm:$0xff]  ;;  %v64_v6 = vld [vmem:[#allocation5 + $0x18] sm:$0xff]  ;;  %vm72_vm1 = vcmask 261120   ;;  %s471_s7 = smov [#allocation8]   ;;  %vm241_vm2 = vcmask 64512  }
  0x38   :  { %336 = vmatprep.subr.bf16.mxu1 %v468_v0  ;;  %327 = vmatprep.mubr.msk.f32.mxu1 %vm469_vm0, %v470_v1  ;;  %v331_v5 = vpack.c.bf16 %v62_v3, %v61_v2  ;;  %v147_v7 = vld [vmem:[#allocation7] sm:$0xff]  ;;  %v148_v8 = vld [vmem:[#allocation7 + $0x8] sm:$0xff]  ;;  %v149_v9 = vld [vmem:[#allocation7 + $0x10] sm:$0xff]  ;;  %v334_v11 = vpack.c.bf16 %v64_v6, %v63_v4  ;;  %s249_s8 = sshll.u32 %s471_s7, 4  ;;  %s250_s8 = int_to_ptr.vmem [resolvable:$true] %s249_s8 }
  0x39   :  { %v150_v10 = vld [vmem:[#allocation7 + $0x18] sm:$0xff]  ;;  %v337_v12 = vpack.c.bf16 %v148_v8, %v147_v7  ;;  %v151_v14 = vld [vmem:[#allocation7 + $0x20] sm:$0xff]  ;;  %v152_v15 = vld [vmem:[#allocation7 + $0x28] sm:$0xff]  ;;  %s435_s9 = scalar_lea.vmem %s250_s8, 128  ;;  %p440_p11 = scmp.lt.s32.totalorder %s250_s8, %s250_s8 }
  0x3a   :  { %332 = vmatpush3.bf16.msra.mxu0 %v331_v5  ;;  %v340_v13 = vpack.c.bf16 %v150_v10, %v149_v9  ;;  %v60_v16 = vld [vmem:[#allocation2] sm:$0xff]  ;;  %v343_v17 = vpack.c.bf16 %v152_v15, %v151_v14  ;;  %v153_v18 = vld [vmem:[#allocation7 + $0x30] sm:$0xff]  ;;  %v155_v21 = vld [vmem:[#allocation7 + $0x40] sm:$0xff]  ;;  %p436_p10 = scmp.ne.s32.totalorder %s250_s8, %s435_s9  ;;  %p441_p12 = scmp.lt.s32.totalorder %s435_s9, %s435_s9 }
  0x3b   :  { %333 = vmatprep.subr.bf16.mxu0 %v468_v0  ;;  %338 = vmatpush3.bf16.msra.mxu1 %v337_v12  ;;  %v154_v19 = vld [vmem:[#allocation7 + $0x38] sm:$0xff]  ;;  %v156_v22 = vld [vmem:[#allocation7 + $0x48] sm:$0xff]  ;;  %v157_v24 = vld [vmem:[#allocation7 + $0x50] sm:$0xff] }
  0x3c   :  { %339 = vmatprep.subr.bf16.mxu1 %v468_v0  ;;  %v346_v20 = vpack.c.bf16 %v154_v19, %v153_v18  ;;  %v349_v23 = vpack.c.bf16 %v156_v22, %v155_v21  ;;  %v158_v25 = vld [vmem:[#allocation7 + $0x58] sm:$0xff]  ;;  %v159_v27 = vld [vmem:[#allocation7 + $0x60] sm:$0xff]  ;;  %v160_v28 = vld [vmem:[#allocation7 + $0x68] sm:$0xff]  ;;  %p442_p13 = por %p441_p12, %p440_p11 }
  0x3d   :  { %v352_v26 = vpack.c.bf16 %v158_v25, %v157_v24  ;;  %v355_v29 = vpack.c.bf16 %v160_v28, %v159_v27  ;;  %v161_v30 = vld [vmem:[#allocation7 + $0x70] sm:$0xff]  ;;  %v162_v31 = vld [vmem:[#allocation7 + $0x78] sm:$0xff] }
  0x3e   :  { %335 = vmatpush3.bf16.msra.mxu0 %v334_v11  ;;  %v358_v32 = vpack.c.bf16 %v162_v31, %v161_v30  ;;  %v259_v33 = vld [vmem:[%s564_s2] ss:$0 sm:$0xff]  ;;  %p443_p0 = pnand %p442_p13, %p436_p10 }
  0x3f   :  { %341 = vmatpush3.bf16.msra.mxu1 %v340_v13  ;;  %v261_v38 = vld [vmem:[%s566_s4] ss:$0 sm:$0xff] }
  0x40   :  { %342 = vmatprep.subr.bf16.mxu1 %v468_v0 }
  0x41   :  { %293 = vmatmul.mubr.msk.f32.vlgmr.msra.gmra.mrb[0].mxu0 %vm72_vm1, %v60_v16 }
  0x43   :  { %344 = vmatpush3.bf16.msra.mxu1 %v343_v17 }
  0x44   :  { %345 = vmatprep.subr.bf16.mxu1 %v468_v0 }
  0x47   :  { %347 = vmatpush3.bf16.msra.mxu1 %v346_v20 }
  0x48   :  { %348 = vmatprep.subr.bf16.mxu1 %v468_v0 }
  0x4b   :  { %350 = vmatpush3.bf16.msra.mxu1 %v349_v23 }
  0x4c   :  { %351 = vmatprep.subr.bf16.mxu1 %v468_v0 }
  0x4f   :  { %353 = vmatpush3.bf16.msra.mxu1 %v352_v26 }
  0x50   :  { %354 = vmatprep.subr.bf16.mxu1 %v468_v0 }
  0x53   :  { %356 = vmatpush3.bf16.msra.mxu1 %v355_v29 }
  0x54   :  { %357 = vmatprep.subr.bf16.mxu1 %v468_v0 }
  0x57   :  { %359 = vmatpush3.bf16.msra.mxu1 %v358_v32 }
 0x114   :  { %v142_v34 = vpop.f32.mrb[0].mxu0 }
 0x115   :  { %v143_v35 = vadd.f32 %v259_v33, %v142_v34  ;;  %v294_v36 = vpop.f32.mrb[1].mxu0 }
 0x117   :  { %v146_v37 = vmax.f32 %v143_v35, 0.0 }
 0x119   :  { %328 = vmatmul.mubr.f32.vlgmr.msra.gmra.mrb[0].mxu1 %v146_v37 }
 0x1ec   :  { %v229_v39 = vpop.f32.mrb[0].mxu1 }
 0x1ed   :  { %v240_v40 = vadd.f32 %v261_v38, %v229_v39  ;;  %v329_v41 = vpop.f32.mrb[1].mxu1 }
 0x1ef   :  { %242 = vst.msk [vmem:[#allocation8] sm:$0xff] %vm241_vm2, %v240_v40 }
 0x1f0   :  { %446 = shalt.err (!%p443_p0)
}
 0x1f1   :  { %s447_s11 = scalar_lea.hbm %s567_s5, 128 }
 0x1f2   :  { %p448_p1 = scmp.ne.s32.totalorder %s567_s5, %s447_s11  ;;  %p451_p2 = scmp.lt.u32.totalorder %s447_s11, %s567_s5 }
 0x1f4   :  { %p453_p3 = pnand %p451_p2, %p448_p1 }
 0x1f6   :  { %456 = shalt.err (!%p453_p3)
}
 0x1f7   :  { %252 = dma.vmem_to_hbm [thread:$0]  %s250_s8, 128, %s567_s5, [#allocation4]  }
 0x1f8   :  { %461 = dma.done.wait [#allocation4], 128  }
 0x1f9   :  { %462 = vsyncadd [#allocation4], 4294967168 }
 0x1fa   :  { %256 = vsyncpa [#allocation3], 1 }
 0x1fb   :  { %257 = vsyncpa [#allocation6], 1 }
 0x1fc   :  { %258 = vsyncpa [#allocation4], 1 }

</bundles_post_ra>
